<compile_context>
chip_gen: v5e
topology: v5e:2x2
jax: 0.10.0
libtpu: 0.0.40
codegen_flags: <defaults>
</compile_context>

<pallas_src>
import functools

import jax
import jax.numpy as jnp
from jax import lax
from jax.experimental import pallas as pl
from jax.experimental.pallas import tpu as pltpu


SPANS_PER_ROW = 128  # spans packed per lane-dense row (lane width = 128 * C)


def _bce_masked_sum_kernel(pred_ref, lab_ref, mask_ref, expt_ref, out_ref, *,
                           M, block_M, K, needs_guard):
    """One lane-dense tile of the masked BCE-with-logits sum.

    pred_ref / lab_ref : (block_M, L) logits / targets, L = 128*C
    mask_ref           : (block_M, 128)  one mask value per span
    expt_ref           : (L, 128) 0/1 class->span reduction matrix (VMEM-resident)
    out_ref            : (1, 1, 128) per-core, per-span-slot f32 partial sums
    """
    p = pl.program_id(0)          # core-split axis ("parallel")
    k = pl.program_id(1)          # reduction axis  ("arbitrary")

    @pl.when(k == 0)
    def _():
        out_ref[...] = jnp.zeros_like(out_ref)

    x = pred_ref[...].astype(jnp.float32)      # (block_M, L)
    z = lab_ref[...].astype(jnp.float32)       # (block_M, L)
    m = mask_ref[...].astype(jnp.float32)      # (block_M, 128)

    # Numerically stable BCE-with-logits (matches torch.nn.BCEWithLogitsLoss):
    #   loss = max(x, 0) - x*z + log1p(exp(-|x|))   (exp/log1p go to the EUP slot)
    loss = jnp.maximum(x, 0.0) - x * z + jnp.log1p(jnp.exp(-jnp.abs(x)))

    # Per-span class sum on the otherwise idle MXU:
    #   span_loss[r, s] = sum_c loss[r, s*C + c]
    # HIGHEST precision keeps the f32 values intact through the MXU.
    span_loss = jnp.dot(loss, expt_ref[...],
                        precision=lax.Precision.HIGHEST,
                        preferred_element_type=jnp.float32)   # (block_M, 128)

    contrib = span_loss * m                                   # C x smaller than full width

    if needs_guard:
        # Only the last (partial) block and any clamped duplicate block need the
        # row guard; gate it on a scalar so interior steps pay nothing.
        b = p * K + k

        def _zero_invalid_rows(c):
            row = b * block_M + lax.broadcasted_iota(jnp.int32, c.shape, 0)
            return jnp.where(row < M, c, 0.0)     # select (not mul): NaN-safe

        contrib = lax.cond((b + 1) * block_M > M,
                           _zero_invalid_rows, lambda c: c, contrib)

    # Per-span-slot f32 partial sums; the tiny final reduce happens in the wrapper.
    out_ref[...] += jnp.sum(contrib, axis=0, keepdims=True)[None]


def _bce_with_logits(x, z):
    x = x.astype(jnp.float32)
    z = z.astype(jnp.float32)
    return jnp.maximum(x, 0.0) - x * z + jnp.log1p(jnp.exp(-jnp.abs(x)))


def _num_tensorcores():
    """2 for v7x-style chips (2 TCs share the grid's 'parallel' axis), else 1."""
    try:
        kind = (jax.devices()[0].device_kind or "").lower()
    except Exception:
        return 1
    return 2 if "7" in kind else 1


def _row_align(*dtypes):
    """Second-to-minor block alignment: 8 for 32-bit, 16 for 16-bit, 32 for 8-bit."""
    a = 8
    for dt in dtypes:
        isz = jnp.dtype(dt).itemsize
        if isz < 4:
            a = max(a, 32 // max(1, isz))
    return a


def pruner_loss(predictions, span_labels, mask, *, block_rows=2048, num_cores=None):
    """sum( BCEWithLogits(predictions, span_labels) * mask[..., None] ) -> scalar f32.

    predictions / span_labels: (B, T, T, C);  mask: (B, T, T).
    """
    if predictions.shape != span_labels.shape:   # emulate predictions.squeeze()
        predictions = predictions.reshape(span_labels.shape)

    rows = int(mask.size)                  # number of (B, T, T) spans
    C = int(span_labels.size) // rows      # classes ("interactions") per span
    R = SPANS_PER_ROW
    L = R * C                              # lane width: multiple of 128, whole spans

    pred2d = predictions.reshape(rows, C)
    lab2d = span_labels.reshape(rows, C)
    mask1d = mask.reshape(rows)

    # Aligned prefix goes through the kernel; a <128-span tail (rare) is a tiny
    # plain-jnp epilogue. No full-tensor jnp.pad copy of predictions/span_labels.
    rows_main = (rows // R) * R
    tail = rows - rows_main
    tail_sum = jnp.float32(0.0)
    if tail:
        xt = pred2d[rows_main:]
        zt = lab2d[rows_main:]
        mt = mask1d[rows_main:].astype(jnp.float32)
        tail_sum = jnp.sum(_bce_with_logits(xt, zt) * mt[:, None])
        pred2d = pred2d[:rows_main]
        lab2d = lab2d[:rows_main]
        mask1d = mask1d[:rows_main]

    if rows_main == 0:
        return tail_sum

    # Lane-dense views: contiguity-preserving reshapes (no extra HBM pass).
    M = rows_main // R
    pred_ld = pred2d.reshape(M, L)
    lab_ld = lab2d.reshape(M, L)
    mask_ld = mask1d.reshape(M, R)          # mask kept in its native dtype

    if num_cores is None:
        num_cores = _num_tensorcores()
    num_cores = max(1, min(int(num_cores), M))

    align = _row_align(pred_ld.dtype, lab_ld.dtype, mask_ld.dtype)

    # Block sizing: large tiles amortise the ~0.35us/step overhead; cap so that
    # double-buffered inputs + f32 intermediates stay well inside the VMEM limit.
    in_isz = max(pred_ld.dtype.itemsize, lab_ld.dtype.itemsize)
    m_isz = mask_ld.dtype.itemsize
    block_M = min(block_rows, M)
    if block_M < M:
        block_M = max(align, (block_M // align) * align)
    budget = 40 * 1024 * 1024
    while block_M > align:
        est = (2 * (2 * block_M * L * in_isz + block_M * R * m_isz)   # dbl-buffered inputs
               + block_M * L * 4                                      # f32 loss feeding the MXU
               + 4 * block_M * R * 4)                                 # span_loss/contrib temps
        if est <= budget:
            break
        block_M = max(align, (block_M // 2 // align) * align)

    m_blocks = pl.cdiv(M, block_M)
    if num_cores > 1 and m_blocks % num_cores:
        # Re-split so every core gets the same number of real blocks (avoids a
        # wasted duplicate-block DMA); only the global last block may be partial.
        target = ((m_blocks + num_cores - 1) // num_cores) * num_cores
        bm = pl.cdiv(M, target)
        if bm < M:
            bm = max(align, ((bm + align - 1) // align) * align)
        block_M = min(block_M, bm)
        m_blocks = pl.cdiv(M, block_M)

    K = pl.cdiv(m_blocks, num_cores)                 # reduction steps per core
    needs_guard = num_cores * K * block_M > M        # partial or duplicated blocks exist

    if needs_guard:
        def data_map(p, k):
            return (jnp.minimum(p * K + k, m_blocks - 1), 0)
    else:
        def data_map(p, k):
            return (p * K + k, 0)

    # 0/1 class->span reduction matrix, built ONCE in the wrapper and kept
    # VMEM-resident via a constant index_map (hoisted out of the kernel body).
    expt = (jnp.arange(L, dtype=jnp.int32)[:, None] // C
            == jnp.arange(R, dtype=jnp.int32)[None, :]).astype(jnp.float32)

    kernel = functools.partial(
        _bce_masked_sum_kernel,
        M=M, block_M=block_M, K=K, needs_guard=needs_guard)

    n_elems = rows_main * C
    cost = pl.CostEstimate(
        flops=10 * n_elems,
        transcendentals=2 * n_elems,
        bytes_accessed=int(pred_ld.size * pred_ld.dtype.itemsize
                           + lab_ld.size * lab_ld.dtype.itemsize
                           + mask_ld.size * mask_ld.dtype.itemsize
                           + expt.size * 4 + num_cores * R * 4))

    partials = pl.pallas_call(
        kernel,
        out_shape=jax.ShapeDtypeStruct((num_cores, 1, R), jnp.float32),
        grid_spec=pltpu.PrefetchScalarGridSpec(
            num_scalar_prefetch=0,
            grid=(num_cores, K),
            in_specs=[
                pl.BlockSpec((block_M, L), data_map),
                pl.BlockSpec((block_M, L), data_map),
                pl.BlockSpec((block_M, R), data_map),
                pl.BlockSpec((L, R), lambda p, k: (0, 0)),   # resident, DMA'd once
            ],
            out_specs=pl.BlockSpec((1, 1, R), lambda p, k: (p, 0, 0)),
        ),
        compiler_params=pltpu.CompilerParams(
            dimension_semantics=("parallel", "arbitrary"),
            vmem_limit_bytes=48 * 1024 * 1024,
        ),
        cost_estimate=cost,
    )(pred_ld, lab_ld, mask_ld, expt)

    # Sum the per-core / per-span-slot partials (tiny) and add the jnp tail.
    return jnp.sum(partials) + tail_sum


def _reference(predictions, span_labels, mask):
    loss = _bce_with_logits(predictions, span_labels)
    return jnp.sum(loss * mask[..., None].astype(jnp.float32))


if __name__ == "__main__":
    # Small shapes: Batch=2, Max Token=8, Interactions/classes=4
    B, T, C = 2, 8, 4
    key = jax.random.PRNGKey(0)
    k1, k2, k3 = jax.random.split(key, 3)

    predictions = jax.random.normal(k1, (B, T, T, C), dtype=jnp.float32)
    span_labels = (jax.random.uniform(k2, (B, T, T, C)) > 0.5).astype(jnp.float32)
    mask = (jax.random.uniform(k3, (B, T, T)) > 0.3).astype(jnp.float32)

    result = jax.block_until_ready(pruner_loss(predictions, span_labels, mask))
    ref = jax.block_until_ready(_reference(predictions, span_labels, mask))

    assert jnp.allclose(result, ref, rtol=1e-5, atol=1e-5), (result, ref)
    print("KERNEL_OK")
</pallas_src>

<mosaic_0001>
module attributes {stable_mosaic.version = 11 : i64} {
  func.func @_bce_masked_sum_kernel(%arg0: i32, %arg1: i32, %arg2: memref<1x512xf32, #tpu.memory_space<vmem>>, %arg3: memref<1x512xf32, #tpu.memory_space<vmem>>, %arg4: memref<1x128xf32, #tpu.memory_space<vmem>>, %arg5: memref<512x128xf32, #tpu.memory_space<vmem>>, %arg6: memref<1x1x128xf32, #tpu.memory_space<vmem>>) attributes {dimension_semantics = [#tpu.dimension_semantics<parallel>, #tpu.dimension_semantics<arbitrary>], iteration_bounds = array<i64: 1, 1>, scalar_prefetch = 0 : i64, scratch_operands = 0 : i64, tpu.core_type = #tpu.core_type<tc>, window_params = [{transform_indices = @transform_0, window_bounds = array<i64: 1, 512>}, {transform_indices = @transform_1, window_bounds = array<i64: 1, 512>}, {transform_indices = @transform_2, window_bounds = array<i64: 1, 128>}, {pipeline_mode = #tpu.pipeline_mode<synchronous>, transform_indices = @transform_3, window_bounds = array<i64: 512, 128>}, {transform_indices = @transform_4, window_bounds = array<i64: 1, 1, 128>}]} {
    %c0_i32 = arith.constant 0 : i32
    %0 = arith.cmpi eq, %arg1, %c0_i32 : i32
    %1 = arith.extui %0 : i1 to i32
    %c0_i32_0 = arith.constant 0 : i32
    %2 = arith.cmpi ne, %1, %c0_i32_0 : i32
    scf.if %2 {
      %cst_17 = arith.constant 0.000000e+00 : f32
      %25 = vector.broadcast %cst_17 : f32 to vector<1x1x128xf32>
      %c0_18 = arith.constant 0 : index
      %c0_19 = arith.constant 0 : index
      %c0_20 = arith.constant 0 : index
      %26 = vector.load %arg6[%c0_18, %c0_19, %c0_20] : memref<1x1x128xf32, #tpu.memory_space<vmem>>, vector<1x1x128xf32>
      tpu.vector_store %arg6[%c0_18, %c0_19, %c0_20], %25 {strides = array<i32>} : memref<1x1x128xf32, #tpu.memory_space<vmem>>, vector<1x1x128xf32>,
    } else {
    }
    %c0 = arith.constant 0 : index
    %c0_1 = arith.constant 0 : index
    %3 = vector.load %arg2[%c0, %c0_1] : memref<1x512xf32, #tpu.memory_space<vmem>>, vector<1x512xf32>
    %c0_2 = arith.constant 0 : index
    %c0_3 = arith.constant 0 : index
    %4 = vector.load %arg3[%c0_2, %c0_3] : memref<1x512xf32, #tpu.memory_space<vmem>>, vector<1x512xf32>
    %c0_4 = arith.constant 0 : index
    %c0_5 = arith.constant 0 : index
    %5 = vector.load %arg4[%c0_4, %c0_5] : memref<1x128xf32, #tpu.memory_space<vmem>>, vector<1x128xf32>
    %cst = arith.constant 0.000000e+00 : f32
    %6 = vector.broadcast %cst : f32 to vector<1x512xf32>
    %7 = arith.maximumf %3, %6 : vector<1x512xf32>
    %8 = arith.mulf %3, %4 : vector<1x512xf32>
    %9 = arith.subf %7, %8 : vector<1x512xf32>
    %10 = math.absf %3 : vector<1x512xf32>
    %cst_6 = arith.constant 0.000000e+00 : f32
    %11 = vector.broadcast %cst_6 : f32 to vector<1x512xf32>
    %12 = arith.subf %11, %10 : vector<1x512xf32>
    %13 = math.exp %12 : vector<1x512xf32>
    %14 = math.log1p %13 : vector<1x512xf32>
    %15 = arith.addf %9, %14 : vector<1x512xf32>
    %c0_7 = arith.constant 0 : index
    %c0_8 = arith.constant 0 : index
    %16 = vector.load %arg5[%c0_7, %c0_8] : memref<512x128xf32, #tpu.memory_space<vmem>>, vector<512x128xf32>
    %cst_9 = arith.constant dense<0.000000e+00> : vector<1x128xf32>
    %17 = tpu.matmul %15, %16, %cst_9 {dimension_numbers = #tpu.dot_dimension_numbers<[1], [0], [0], [1], [0, 0, 1, 1], [], []>, precision = #tpu.contract_precision<fp32>} : vector<1x512xf32>, vector<512x128xf32>, vector<1x128xf32> -> vector<1x128xf32>
    %18 = arith.mulf %17, %5 : vector<1x128xf32>
    %c0_10 = arith.constant 0 : index
    %c0_11 = arith.constant 0 : index
    %c0_12 = arith.constant 0 : index
    %19 = vector.load %arg6[%c0_10, %c0_11, %c0_12] : memref<1x1x128xf32, #tpu.memory_space<vmem>>, vector<1x1x128xf32>
    %cst_13 = arith.constant dense<0.000000e+00> : vector<128xf32>
    %20 = vector.multi_reduction <add>, %18, %cst_13 [0] : vector<1x128xf32> to vector<128xf32>
    %21 = vector.shape_cast %20 : vector<128xf32> to vector<1x128xf32>
    %22 = vector.shape_cast %21 : vector<1x128xf32> to vector<1x1x128xf32>
    %23 = arith.addf %19, %22 : vector<1x1x128xf32>
    %c0_14 = arith.constant 0 : index
    %c0_15 = arith.constant 0 : index
    %c0_16 = arith.constant 0 : index
    %24 = vector.load %arg6[%c0_14, %c0_15, %c0_16] : memref<1x1x128xf32, #tpu.memory_space<vmem>>, vector<1x1x128xf32>
    tpu.vector_store %arg6[%c0_14, %c0_15, %c0_16], %23 {strides = array<i32>} : memref<1x1x128xf32, #tpu.memory_space<vmem>>, vector<1x1x128xf32>,
    return
  }
  func.func @transform_0(%arg0: i32, %arg1: i32) -> (i32, i32) {
    %c1_i32 = arith.constant 1 : i32
    %0 = arith.muli %arg0, %c1_i32 : i32
    %1 = arith.addi %0, %arg1 : i32
    %c0_i32 = arith.constant 0 : i32
    %c0_i32_0 = arith.constant 0 : i32
    return %1, %c0_i32 : i32, i32
  }
  func.func @transform_1(%arg0: i32, %arg1: i32) -> (i32, i32) {
    %c1_i32 = arith.constant 1 : i32
    %0 = arith.muli %arg0, %c1_i32 : i32
    %1 = arith.addi %0, %arg1 : i32
    %c0_i32 = arith.constant 0 : i32
    %c0_i32_0 = arith.constant 0 : i32
    return %1, %c0_i32 : i32, i32
  }
  func.func @transform_2(%arg0: i32, %arg1: i32) -> (i32, i32) {
    %c1_i32 = arith.constant 1 : i32
    %0 = arith.muli %arg0, %c1_i32 : i32
    %1 = arith.addi %0, %arg1 : i32
    %c0_i32 = arith.constant 0 : i32
    %c0_i32_0 = arith.constant 0 : i32
    return %1, %c0_i32 : i32, i32
  }
  func.func @transform_3(%arg0: i32, %arg1: i32) -> (i32, i32) {
    %c0_i32 = arith.constant 0 : i32
    %c0_i32_0 = arith.constant 0 : i32
    %c0_i32_1 = arith.constant 0 : i32
    return %c0_i32, %c0_i32_0 : i32, i32
  }
  func.func @transform_4(%arg0: i32, %arg1: i32) -> (i32, i32, i32) {
    %c0_i32 = arith.constant 0 : i32
    %c0_i32_0 = arith.constant 0 : i32
    %c0_i32_1 = arith.constant 0 : i32
    return %arg0, %c0_i32, %c0_i32_0 : i32, i32, i32
  }
}

</mosaic_0001>

<bundles_post_ra>
// kernel: tpu_custom_call.1
= control target key start
LH: loop header
LB: loop body
LE: loop exit
PB: predicated region body
PF: predicated region fallthrough
CT: control target
= control target key end

     0   :  { %9 = vsyncpa [#allocation3], 0  ;;  %s2747_s0 = inlined_call_operand.hbm [shape: f32[1,512], index: 0, kind: input, shape index: {}]   ;;  %s2748_s1 = inlined_call_operand.hbm [shape: f32[1,512], index: 1, kind: input, shape index: {}]   ;;  %s2749_s2 = inlined_call_operand.vmem [shape: f32[1,128], index: 2, kind: input, shape index: {}]   ;;  %s2750_s3 = inlined_call_operand.hbm [shape: f32[512,128], index: 3, kind: input, shape index: {}]   ;;  %s2751_s4 = inlined_call_operand.hbm [shape: f32[1,1,128], index: 4, kind: output, shape index: {}]  }
   0x1   :  { %10 = vsyncpa [#allocation6], 0  ;;  %s34_s17 = sshll.u32 %s2748_s1, 4  ;;  %s35_s17 = int_to_ptr.hbm [resolvable:$true] %s34_s17 }
   0x2   :  { %11 = vsyncpa [#allocation4], 0  ;;  %s1684_s18 = smov [#allocation5]   ;;  %s20_s22 = sshll.u32 %s2747_s0, 4  ;;  %s21_s22 = int_to_ptr.hbm [resolvable:$true] %s20_s22 }
   0x3   :  { %s36_s19 = sshll.u32 %s1684_s18, 4  ;;  %s1685_s23 = smov [#allocation2]   ;;  %s37_s19 = int_to_ptr.vmem [resolvable:$true] %s36_s19 }
   0x4   :  { %39 = dma.hbm_to_vmem [thread:$0]  %s35_s17, 64, %s37_s19, [#allocation6]  }
   0x5   :  { %s22_s24 = sshll.u32 %s1685_s23, 4  ;;  %s51_s27 = sshll.u32 %s2750_s3, 4  ;;  %s23_s24 = int_to_ptr.vmem [resolvable:$true] %s22_s24  ;;  %s52_s27 = int_to_ptr.hbm [resolvable:$true] %s51_s27 }
   0x6   :  { %25 = dma.hbm_to_vmem [thread:$0]  %s21_s22, 64, %s23_s24, [#allocation3]  }
   0x7   :  { %s1686_s1 = smov [#allocation7]   ;;  %s1687_s29 = smov 128  }
   0x8   :  { %s53_s28 = sshll.u32 %s1686_s1, 4  ;;  %s1688_s30 = smov 8   ;;  %s54_s28 = int_to_ptr.vmem [resolvable:$true] %s53_s28 }
   0x9   :  { %59 = dma.hbm_to_vmem [thread:$0]  %s52_s27, 8192, %s54_s28, [#allocation6], %s1687_s29, %s1687_s29, %s1688_s30  }
   0xa   :  { %1678 = dma.done.wait [#allocation3], 64  }
   0xb   :  { %1679 = vsyncadd [#allocation3], 4294967232 }
   0xc   :  { %1680 = dma.done.wait [#allocation6], 8256  }
   0xd   :  { %1681 = vsyncadd [#allocation6], 4294959040  ;;  %v123_v0 = vld [vmem:[#allocation7 + $0x78] sm:$0xff]  ;;  %v122_v1 = vld [vmem:[#allocation7 + $0x70] sm:$0xff]  ;;  %s1690_s5 = smov [#allocation8]   ;;  %s1557_s9 = sshll.u32 %s2751_s4, 4  ;;  %s1558_s9 = int_to_ptr.hbm [resolvable:$true] %s1557_s9 }
   0xe   :  { %v121_v2 = vld [vmem:[#allocation7 + $0x68] sm:$0xff]  ;;  %v1725_v3 = vand.u32 4294901760, %v123_v0  ;;  %v1727_v4 = vand.u32 4294901760, %v122_v1  ;;  %v120_v6 = vld [vmem:[#allocation7 + $0x60] sm:$0xff]  ;;  %v119_v7 = vld [vmem:[#allocation7 + $0x58] sm:$0xff]  ;;  %s1555_s6 = sshll.u32 %s1690_s5, 4  ;;  %s1556_s6 = int_to_ptr.vmem [resolvable:$true] %s1555_s6 }
   0xf   :  { %v1729_v5 = vand.u32 4294901760, %v121_v2  ;;  %v118_v8 = vld [vmem:[#allocation7 + $0x50] sm:$0xff]  ;;  %v1731_v9 = vand.u32 4294901760, %v120_v6  ;;  %v1733_v10 = vand.u32 4294901760, %v119_v7  ;;  %v117_v12 = vld [vmem:[#allocation7 + $0x48] sm:$0xff]  ;;  %v116_v13 = vld [vmem:[#allocation7 + $0x40] sm:$0xff] }
  0x10   :  { %v1735_v11 = vand.u32 4294901760, %v118_v8  ;;  %182 = vmatpush.msra.mxu0 %v1725_v3  ;;  %v1739_v14 = vsub.f32 %v123_v0, %v1725_v3  ;;  %v1742_v15 = vsub.f32 %v122_v1, %v1727_v4  ;;  %378 = vmatpush.msra.mxu3 %v1725_v3  ;;  %v1748_v17 = vand.u32 4294901760, %v117_v12  ;;  %v115_v21 = vld [vmem:[#allocation7 + $0x38] sm:$0xff]  ;;  %v114_v26 = vld [vmem:[#allocation7 + $0x30] sm:$0xff]  ;;  %v113_v36 = vld [vmem:[#allocation7 + $0x28] sm:$0xff] }
  0x11   :  { %v1746_v16 = vsub.f32 %v121_v2, %v1729_v5  ;;  %v1751_v18 = vsub.f32 %v120_v6, %v1731_v9  ;;  %v1754_v19 = vsub.f32 %v119_v7, %v1733_v10  ;;  %v1764_v25 = vand.u32 4294901760, %v116_v13  ;;  %v112_v42 = vld [vmem:[#allocation7 + $0x20] sm:$0xff]  ;;  %v111_v47 = vld [vmem:[#allocation7 + $0x18] sm:$0xff]  ;;  %v110_v54 = vld [vmem:[#allocation7 + $0x10] sm:$0xff] }
  0x12   :  { %v1757_v20 = vsub.f32 %v118_v8, %v1735_v11  ;;  %184 = vmatpush.msra.mxu0 %v1727_v4  ;;  %325 = vmatpush.msra.mxu2 %v1739_v14  ;;  %v224_v22 = vand.u32 4294901760, %v1739_v14  ;;  %v2766_v23 = vand.u32 4294901760, %v1742_v15  ;;  %v1770_v29 = vsub.f32 %v117_v12, %v1748_v17  ;;  %v139_v59 = vld [vmem:[#allocation7 + $0xf8] sm:$0xff]  ;;  %v109_v61 = vld [vmem:[#allocation7 + $0x8] sm:$0xff]  ;;  %v108_v2 = vld [vmem:[#allocation7] sm:$0xff] }
  0x13   :  { %v2765_v24 = vand.u32 4294901760, %v1746_v16  ;;  %380 = vmatpush.msra.mxu3 %v1727_v4  ;;  %v2764_v27 = vand.u32 4294901760, %v1751_v18  ;;  %v2761_v28 = vand.u32 4294901760, %v1754_v19  ;;  %v1783_v33 = vand.u32 4294901760, %v115_v21  ;;  %v138_v6 = vld [vmem:[#allocation7 + $0xf0] sm:$0xff] }
  0x14   :  { %186 = vmatpush.msra.mxu0 %v1729_v5  ;;  %328 = vmatpush.msra.mxu2 %v1742_v15  ;;  %v225_v30 = vsub.f32 %v1739_v14, %v224_v22  ;;  %v231_v31 = vsub.f32 %v1742_v15, %v2766_v23  ;;  %v1786_v34 = vand.u32 4294901760, %v114_v26  ;;  %v2759_v35 = vand.u32 4294901760, %v1757_v20  ;;  %v130_v23 = vld [vmem:[#allocation7 + $0xb0] sm:$0xff] }
  0x15   :  { %v237_v32 = vsub.f32 %v1746_v16, %v2765_v24  ;;  %382 = vmatpush.msra.mxu3 %v1729_v5  ;;  %v243_v39 = vsub.f32 %v1751_v18, %v2764_v27  ;;  %v1795_v40 = vsub.f32 %v116_v13, %v1764_v25  ;;  %v249_v41 = vsub.f32 %v1754_v19, %v2761_v28  ;;  %v128_v27 = vld [vmem:[#allocation7 + $0xa0] sm:$0xff] }
  0x16   :  { %188 = vmatpush.msra.mxu0 %v1731_v9  ;;  %v226_v37 = vand.u32 4294901760, %v225_v30  ;;  %331 = vmatpush.msra.mxu2 %v1746_v16  ;;  %v232_v38 = vand.u32 4294901760, %v231_v31  ;;  %v1802_v44 = vand.u32 4294901760, %v113_v36  ;;  %v2758_v45 = vand.u32 4294901760, %v1770_v29 }
  0x17   :  { %384 = vmatpush.msra.mxu3 %v1731_v9  ;;  %v238_v43 = vand.u32 4294901760, %v237_v32  ;;  %v1806_v46 = vsub.f32 %v115_v21, %v1783_v33  ;;  %v255_v48 = vsub.f32 %v1757_v20, %v2759_v35  ;;  %v244_v49 = vand.u32 4294901760, %v243_v39  ;;  %v137_v32 = vld [vmem:[#allocation7 + $0xe8] sm:$0xff] }
  0x18   :  { %190 = vmatpush.msra.mxu0 %v1733_v10  ;;  %227 = vmatpush.msra.mxu1 %v226_v37  ;;  %v1814_v50 = vand.u32 4294901760, %v112_v42  ;;  %v2757_v51 = vand.u32 4294901760, %v1795_v40  ;;  %v1818_v52 = vsub.f32 %v114_v26, %v1786_v34  ;;  %v1822_v53 = vand.u32 4294901760, %v111_v47 }
  0x19   :  { %334 = vmatpush.msra.mxu2 %v1751_v18  ;;  %386 = vmatpush.msra.mxu3 %v1733_v10  ;;  %v250_v55 = vand.u32 4294901760, %v249_v41  ;;  %v261_v56 = vsub.f32 %v1770_v29, %v2758_v45  ;;  %v2756_v57 = vand.u32 4294901760, %v1806_v46  ;;  %v1830_v58 = vsub.f32 %v113_v36, %v1802_v44  ;;  %v132_v45 = vld [vmem:[#allocation7 + $0xc0] sm:$0xff] }
  0x1a   :  { %192 = vmatpush.msra.mxu0 %v1735_v11  ;;  %233 = vmatpush.msra.mxu1 %v232_v38  ;;  %v256_v60 = vand.u32 4294901760, %v255_v48  ;;  %v267_v62 = vsub.f32 %v1795_v40, %v2757_v51  ;;  %v1838_v63 = vand.u32 4294901760, %v110_v54  ;;  %v2755_v0 = vand.u32 4294901760, %v1818_v52 }
  0x1b   :  { %337 = vmatpush.msra.mxu2 %v1754_v19  ;;  %388 = vmatpush.msra.mxu3 %v1735_v11  ;;  %v1842_v1 = vsub.f32 %v112_v42, %v1814_v50  ;;  %v1847_v7 = vsub.f32 %v111_v47, %v1822_v53  ;;  %v1849_v8 = vand.u32 4294901760, %v139_v59  ;;  %v262_v12 = vand.u32 4294901760, %v261_v56 }
  0x1c   :  { %194 = vmatpush.msra.mxu0 %v1748_v17  ;;  %239 = vmatpush.msra.mxu1 %v238_v43  ;;  %v273_v13 = vsub.f32 %v1806_v46, %v2756_v57  ;;  %v1855_v21 = vand.u32 4294901760, %v109_v61  ;;  %v2753_v26 = vand.u32 4294901760, %v1830_v58  ;;  %v1860_v30 = vand.u32 4294901760, %v108_v2  ;;  %v136_v43 = vld [vmem:[#allocation7 + $0xe0] sm:$0xff]  ;;  %v133_v57 = vld [vmem:[#allocation7 + $0xc8] sm:$0xff] }
  0x1d   :  { %340 = vmatpush.msra.mxu2 %v1757_v20  ;;  %390 = vmatpush.msra.mxu3 %v1748_v17  ;;  %2801 = vst [vmem:[#allocation12_spill] sm:$0xff] %v1849_v8  ;;  %v1862_v31 = vand.u32 4294901760, %v138_v6  ;;  %v268_v36 = vand.u32 4294901760, %v267_v62  ;;  %v279_v37 = vsub.f32 %v1818_v52, %v2755_v0  ;;  %v2752_v38 = vand.u32 4294901760, %v1842_v1 }
  0x1e   :  { %196 = vmatpush.msra.mxu0 %v1764_v25  ;;  %245 = vmatpush.msra.mxu1 %v244_v49  ;;  %2802 = vst [vmem:[#allocation13_spill] sm:$0xff] %v1860_v30  ;;  %v1870_v39 = vsub.f32 %v110_v54, %v1838_v63  ;;  %v2754_v41 = vand.u32 4294901760, %v1847_v7  ;;  %v1876_v42 = vsub.f32 %v139_v59, %v1849_v8  ;;  %v274_v47 = vand.u32 4294901760, %v273_v13  ;;  %v135_v59 = vld [vmem:[#allocation7 + $0xd8] sm:$0xff]  ;;  %v134_v13 = vld [vmem:[#allocation7 + $0xd0] sm:$0xff] }
  0x1f   :  { %343 = vmatpush.msra.mxu2 %v1770_v29  ;;  %392 = vmatpush.msra.mxu3 %v1764_v25  ;;  %v285_v48 = vsub.f32 %v1830_v58, %v2753_v26  ;;  %v1883_v49 = vsub.f32 %v109_v61, %v1855_v21  ;;  %v1885_v54 = vand.u32 4294901760, %v137_v32  ;;  %v1893_v56 = vsub.f32 %v138_v6, %v1862_v31 }
  0x20   :  { %198 = vmatpush.msra.mxu0 %v1783_v33  ;;  %251 = vmatpush.msra.mxu1 %v250_v55  ;;  %v1890_v55 = vsub.f32 %v108_v2, %v1860_v30  ;;  %v291_v61 = vsub.f32 %v1842_v1, %v2752_v38  ;;  %v2760_v62 = vand.u32 4294901760, %v1870_v39  ;;  %v297_v2 = vsub.f32 %v1847_v7, %v2754_v41 }
  0x21   :  { %346 = vmatpush.msra.mxu2 %v1795_v40  ;;  %394 = vmatpush.msra.mxu3 %v1783_v33  ;;  %2803 = vst [vmem:[#allocation14_spill] sm:$0xff] %v1893_v56  ;;  %v2762_v6 = vand.u32 4294901760, %v1876_v42  ;;  %v1911_v38 = vsub.f32 %v137_v32, %v1885_v54  ;;  %v1913_v26 = vand.u32 4294901760, %v135_v59  ;;  %v2767_v0 = vand.u32 4294901760, %v1893_v56 }
  0x22   :  { %200 = vmatpush.msra.mxu0 %v1786_v34  ;;  %257 = vmatpush.msra.mxu1 %v256_v60  ;;  %v280_v60 = vand.u32 4294901760, %v279_v37  ;;  %v2763_v37 = vand.u32 4294901760, %v1883_v49  ;;  %v2768_v41 = vand.u32 4294901760, %v1890_v55  ;;  %v303_v32 = vsub.f32 %v1870_v39, %v2760_v62 }
  0x23   :  { %349 = vmatpush.msra.mxu2 %v1806_v46  ;;  %396 = vmatpush.msra.mxu3 %v1786_v34  ;;  %2804 = vst [vmem:[#allocation15_spill] sm:$0xff] %v1911_v38  ;;  %v1926_v51 = vand.u32 4294901760, %v134_v13  ;;  %v298_v35 = vand.u32 4294901760, %v297_v2  ;;  %v1939_v62 = vsub.f32 %v135_v59, %v1913_v26  ;;  %v1941_v28 = vand.u32 4294901760, %v133_v57  ;;  %v131_v2 = vld [vmem:[#allocation7 + $0xb8] sm:$0xff] }
  0x24   :  { %202 = vmatpush.msra.mxu0 %v1802_v44  ;;  %263 = vmatpush.msra.mxu1 %v262_v12  ;;  %v1900_v12 = vand.u32 4294901760, %v136_v43  ;;  %v315_v59 = vsub.f32 %v1890_v55, %v2768_v41  ;;  %v2805_v41 = vand.u32 4294901760, %v1911_v38  ;;  %v2806_v14 = vand.u32 4294901760, %v1742_v15 }
  0x25   :  { %352 = vmatpush.msra.mxu2 %v1818_v52  ;;  %398 = vmatpush.msra.mxu3 %v1802_v44  ;;  %v1956_v24 = vsub.f32 %v134_v13, %v1926_v51 }
  0x26   :  { %204 = vmatpush.msra.mxu0 %v1814_v50  ;;  %269 = vmatpush.msra.mxu1 %v268_v36  ;;  %v286_v36 = vand.u32 4294901760, %v285_v48  ;;  %v1924_v48 = vsub.f32 %v136_v43, %v1900_v12  ;;  %v309_v43 = vsub.f32 %v1883_v49, %v2763_v37  ;;  %v304_v37 = vand.u32 4294901760, %v303_v32 }
  0x27   :  { %355 = vmatpush.msra.mxu2 %v1830_v58  ;;  %400 = vmatpush.msra.mxu3 %v1814_v50  ;;  %v578_v13 = vsub.f32 %v1911_v38, %v2805_v41  ;;  %v316_v41 = vand.u32 4294901760, %v315_v59  ;;  %v2809_v59 = vand.u32 4294901760, %v1939_v62 }
  0x28   :  { %206 = vmatpush.msra.mxu0 %v1822_v53  ;;  %275 = vmatpush.msra.mxu1 %v274_v47  ;;  %v292_v47 = vand.u32 4294901760, %v291_v61  ;;  %v1958_v61 = vld [vmem:[#allocation2] sm:$0xf]  ;;  %v310_v32 = vand.u32 4294901760, %v309_v43  ;;  %v129_v43 = vld [vmem:[#allocation7 + $0xa8] sm:$0xff] }
  0x29   :  { %358 = vmatpush.msra.mxu2 %v1842_v1  ;;  %402 = vmatpush.msra.mxu3 %v1822_v53 }
  0x2a   :  { %208 = vmatpush.msra.mxu0 %v1838_v63  ;;  %281 = vmatpush.msra.mxu1 %v280_v60  ;;  %v566_v60 = vsub.f32 %v1876_v42, %v2762_v6  ;;  %v1948_v6 = vand.u32 4294901760, %v132_v45 }
  0x2b   :  { %361 = vmatpush.msra.mxu2 %v1847_v7  ;;  %404 = vmatpush.msra.mxu3 %v1838_v63 }
  0x2c   :  { %210 = vmatpush.msra.mxu0 %v1855_v21  ;;  %287 = vmatpush.msra.mxu1 %v286_v36  ;;  %v572_v36 = vsub.f32 %v1893_v56, %v2767_v0  ;;  %v567_v0 = vand.u32 4294901760, %v566_v60  ;;  %v1971_v56 = vsub.f32 %v133_v57, %v1941_v28  ;;  %v1979_v60 = vand.u32 4294901760, %v130_v23 }
  0x2d   :  { %364 = vmatpush.msra.mxu2 %v1870_v39  ;;  %406 = vmatpush.msra.mxu3 %v1855_v21  ;;  %v2807_v57 = vand.u32 4294901760, %v1924_v48 }
  0x2e   :  { %212 = vmatpush.msra.mxu0 %v1860_v30  ;;  %293 = vmatpush.msra.mxu1 %v292_v47  ;;  %v1963_v47 = vand.u32 4294901760, %v131_v2 }
  0x2f   :  { %367 = vmatpush.msra.mxu2 %v1883_v49  ;;  %408 = vmatpush.msra.mxu3 %v1860_v30  ;;  %v94_v30 = vand.u32 2147483647, %v1958_v61  ;;  %v584_v15 = vsub.f32 %v1924_v48, %v2807_v57 }
  0x30   :  { %419 = vmatpush.msrb.mxu0 %v224_v22  ;;  %299 = vmatpush.msra.mxu1 %v298_v35  ;;  %v573_v22 = vand.u32 4294901760, %v572_v36  ;;  %v1977_v35 = vsub.f32 %v132_v45, %v1948_v6  ;;  %v2808_v36 = vand.u32 4294901760, %v1746_v16  ;;  %v1990_v45 = vsub.f32 %v131_v2, %v1963_v47 }
  0x31   :  { %370 = vmatpush.msra.mxu2 %v1890_v55  ;;  %568 = vmatpush.msrb.mxu3 %v567_v0  ;;  %v95_v38 = vsub.f32 0.0, %v94_v30  ;;  %v2810_v16 = vand.u32 4294901760, %v1751_v18  ;;  %v2003_v30 = vsub.f32 %v130_v23, %v1979_v60  ;;  %v2005_v2 = vand.u32 4294901760, %v128_v27 }
  0x32   :  { %423 = vmatpush.msrb.mxu0 %v2806_v14  ;;  %305 = vmatpush.msra.mxu1 %v304_v37  ;;  %v579_v37 = vand.u32 4294901760, %v578_v13  ;;  %v1997_v14 = vand.u32 4294901760, %v129_v43  ;;  %v2777_v0 = vand.u32 4294901760, %v1977_v35  ;;  %v2812_v18 = vand.u32 4294901760, %v1754_v19 }
  0x33   :  { %523 = vmatpush.msrb.mxu2 %v1849_v8  ;;  %v590_v8 = vsub.f32 %v1939_v62, %v2809_v59  ;;  %574 = vmatpush.msrb.mxu3 %v573_v22  ;;  %v96_v13 = vmul.f32 1.442695, %v95_v38  ;;  %v2811_v59 = vand.u32 4294901760, %v1956_v24  ;;  %v2776_v23 = vand.u32 4294901760, %v1990_v45  ;;  %v126_v22 = vld [vmem:[#allocation7 + $0x90] sm:$0xff] }
  0x34   :  { %427 = vmatpush.msrb.mxu0 %v2808_v36  ;;  %311 = vmatpush.msra.mxu1 %v310_v32  ;;  %v127_v32 = vld [vmem:[#allocation7 + $0x98] sm:$0xff]  ;;  %v585_v36 = vand.u32 4294901760, %v584_v15  ;;  %v2814_v19 = vand.u32 4294901760, %v1757_v20  ;;  %v2815_v20 = vand.u32 4294901760, %v1770_v29 }
  0x35   :  { %525 = vmatpush.msrb.mxu2 %v1862_v31  ;;  %v596_v57 = vsub.f32 %v1956_v24, %v2811_v59  ;;  %1578 = vpow2.f32 %v96_v13  ;;  %580 = vmatpush.msrb.mxu3 %v579_v37  ;;  %v591_v38 = vand.u32 4294901760, %v590_v8  ;;  %v2022_v59 = vand.u32 4294901760, %v127_v32  ;;  %v125_v13 = vld [vmem:[#allocation7 + $0x88] sm:$0xff] }
  0x36   :  { %431 = vmatpush.msrb.mxu0 %v2810_v16  ;;  %317 = vmatpush.msra.mxu1 %v316_v41  ;;  %v2813_v41 = vand.u32 4294901760, %v1971_v56  ;;  %v2020_v16 = vsub.f32 %v129_v43, %v1997_v14  ;;  %v2778_v8 = vand.u32 4294901760, %v2003_v30  ;;  %v2032_v37 = vsub.f32 %v128_v27, %v2005_v2 }
  0x37   :  { %527 = vmatpush.msrb.mxu2 %v1885_v54  ;;  %586 = vmatpush.msrb.mxu3 %v585_v36  ;;  %v597_v43 = vand.u32 4294901760, %v596_v57  ;;  %v2046_v57 = vsub.f32 %v127_v32, %v2022_v59  ;;  %v2048_v36 = vand.u32 4294901760, %v125_v13  ;;  %v89_v32 = vld [vmem:[#allocation5] sm:$0xf] }
  0x38   :  { %435 = vmatpush.msrb.mxu0 %v2812_v18  ;;  %486 = vmatpush.msrb.mxu1 %v1725_v3  ;;  %v602_v15 = vsub.f32 %v1971_v56, %v2813_v41  ;;  %v608_v3 = vsub.f32 %v1977_v35, %v2777_v0  ;;  %v2035_v18 = vand.u32 4294901760, %v126_v22  ;;  %v124_v41 = vld [vmem:[#allocation7 + $0x80] sm:$0xff] }
  0x39   :  { %529 = vmatpush.msrb.mxu2 %v1900_v12  ;;  %592 = vmatpush.msrb.mxu3 %v591_v38  ;;  %v2819_v38 = vand.u32 4294901760, %v1818_v52 }
  0x3a   :  { %439 = vmatpush.msrb.mxu0 %v2814_v19  ;;  %488 = vmatpush.msrb.mxu1 %v1727_v4  ;;  %v614_v4 = vsub.f32 %v1990_v45, %v2776_v23  ;;  %v603_v27 = vand.u32 4294901760, %v602_v15  ;;  %v620_v23 = vsub.f32 %v2003_v30, %v2778_v8  ;;  %v2059_v19 = vsub.f32 %v126_v22, %v2035_v18 }
  0x3b   :  { %531 = vmatpush.msrb.mxu2 %v1913_v26  ;;  %v1579_v29 = vpop.eup %1578  ;;  %598 = vmatpush.msrb.mxu3 %v597_v43  ;;  %v637_v8 = vand.u32 4294901760, %v2046_v57  ;;  %v2072_v22 = vsub.f32 %v125_v13, %v2048_v36 }
  0x3c   :  { %443 = vmatpush.msrb.mxu0 %v2815_v20  ;;  %490 = vmatpush.msrb.mxu1 %v1729_v5  ;;  %v2816_v20 = vand.u32 4294901760, %v1795_v40  ;;  %v609_v5 = vand.u32 4294901760, %v608_v3  ;;  %v98_v15 = vadd.f32 1.0, %v1579_v29  ;;  %v101_v0 = vmul.f32 -0.5, %v1579_v29 }
  0x3d   :  { %533 = vmatpush.msrb.mxu2 %v1926_v51  ;;  %v2061_v40 = vand.u32 4294901760, %v124_v41  ;;  %v615_v3 = vand.u32 4294901760, %v614_v4  ;;  %604 = vmatpush.msrb.mxu3 %v603_v27  ;;  %v92_v4 = vmul.f32 %v89_v32, %v1958_v61  ;;  %v104_v13 = vand.u32 2147483647, %v1579_v29 }
  0x3e   :  { %447 = vmatpush.msrb.mxu0 %v2816_v20  ;;  %492 = vmatpush.msrb.mxu1 %v1731_v9  ;;  %v2817_v9 = vand.u32 4294901760, %v1806_v46  ;;  %v2818_v20 = vand.u32 4294901760, %v2020_v16  ;;  %1580 = vlog2.f32 %v98_v15  ;;  %v91_v46 = vmax.f32 %v1958_v61, 0.0 }
  0x3f   :  { %535 = vmatpush.msrb.mxu2 %v1941_v28  ;;  %v102_v27 = vadd.f32 1.0, %v101_v0  ;;  %610 = vmatpush.msrb.mxu3 %v609_v5  ;;  %v2085_v52 = vsub.f32 %v124_v41, %v2061_v40  ;;  %v638_v0 = vsub.f32 %v2046_v57, %v637_v8  ;;  %v2822_v5 = vand.u32 4294901760, %v1842_v1 }
  0x40   :  { %451 = vmatpush.msrb.mxu0 %v2817_v9  ;;  %494 = vmatpush.msrb.mxu1 %v1733_v10  ;;  %v626_v43 = vsub.f32 %v2020_v16, %v2818_v20  ;;  %v621_v10 = vand.u32 4294901760, %v620_v23  ;;  %v2820_v9 = vand.u32 4294901760, %v2032_v37  ;;  %v643_v20 = vand.u32 4294901760, %v2059_v19 }
  0x41   :  { %537 = vmatpush.msrb.mxu2 %v1948_v6  ;;  %616 = vmatpush.msrb.mxu3 %v615_v3  ;;  %v649_v23 = vand.u32 4294901760, %v2072_v22  ;;  %v93_v41 = vsub.f32 %v91_v46, %v92_v4  ;;  %vm105_vm0 = vcmp.lt.f32.partialorder %v104_v13, 0.0004427343  ;;  %v655_v3 = vand.u32 4294901760, %v2085_v52 }
  0x42   :  { %455 = vmatpush.msrb.mxu0 %v2819_v38  ;;  %496 = vmatpush.msrb.mxu1 %v1735_v11  ;;  %v632_v15 = vsub.f32 %v2032_v37, %v2820_v9  ;;  %v2821_v11 = vand.u32 4294901760, %v1830_v58  ;;  %v627_v61 = vand.u32 4294901760, %v626_v43  ;;  %v103_v58 = vmul.f32 %v1579_v29, %v102_v27 }
  0x43   :  { %539 = vmatpush.msrb.mxu2 %v1963_v47  ;;  %622 = vmatpush.msrb.mxu3 %v621_v10  ;;  %v644_v32 = vsub.f32 %v2059_v19, %v643_v20  ;;  %v2823_v43 = vand.u32 4294901760, %v1847_v7  ;;  %v639_v1 = vand.u32 4294901760, %v638_v0  ;;  %v650_v29 = vsub.f32 %v2072_v22, %v649_v23 }
  0x44   :  { %459 = vmatpush.msrb.mxu0 %v2821_v11  ;;  %498 = vmatpush.msrb.mxu1 %v1748_v17  ;;  %v1581_v38 = vpop.eup %1580  ;;  %v633_v17 = vand.u32 4294901760, %v632_v15  ;;  %v2824_v10 = vand.u32 4294901760, %v1870_v39  ;;  %v656_v4 = vsub.f32 %v2085_v52, %v655_v3  ;;  %v2825_v27 = vand.u32 4294901760, %v1883_v49 }
  0x45   :  { %541 = vmatpush.msrb.mxu2 %v1979_v60  ;;  %628 = vmatpush.msrb.mxu3 %v627_v61  ;;  %v651_v39 = vand.u32 4294901760, %v650_v29  ;;  %v2826_v15 = vand.u32 4294901760, %v1890_v55  ;;  %v2827_v0 = vand.u32 4294901760, %v1876_v42  ;;  %v150_v29 = vld [vmem:[#allocation7 + $0x150] sm:$0xff] }
  0x46   :  { %463 = vmatpush.msrb.mxu0 %v2822_v5  ;;  %500 = vmatpush.msrb.mxu1 %v1764_v25  ;;  %v100_v25 = vmul.f32 0.6931472, %v1581_v38  ;;  %v657_v49 = vand.u32 4294901760, %v656_v4 }
  0x47   :  { %543 = vmatpush.msrb.mxu2 %v1997_v14  ;;  %634 = vmatpush.msrb.mxu3 %v633_v17  ;;  %v2831_v17 = vld [vmem:[#allocation13_spill] sm:$0xff] }
  0x48   :  { %467 = vmatpush.msrb.mxu0 %v2823_v43  ;;  %502 = vmatpush.msrb.mxu1 %v1783_v33  ;;  %v106_v46 = vsel %vm105_vm0, %v103_v58, %v100_v25  ;;  %v645_v33 = vand.u32 4294901760, %v644_v32  ;;  %v2832_v43 = vld [vmem:[#allocation15_spill] sm:$0xff]  ;;  %v2834_v25 = vand.u32 4294901760, %v1924_v48 }
  0x49   :  { %545 = vmatpush.msrb.mxu2 %v2005_v2  ;;  %v2114_v7 = vadd.f32 %v106_v46, %v93_v41  ;;  %640 = vmatpush.msrb.mxu3 %v639_v1  ;;  %v2828_v41 = vld [vmem:[#allocation14_spill] sm:$0xff]  ;;  %v2835_v1 = vand.u32 4294901760, %v1939_v62 }
  0x4a   :  { %471 = vmatpush.msrb.mxu0 %v2824_v10  ;;  %504 = vmatpush.msrb.mxu1 %v1786_v34  ;;  %v2829_v58 = vand.u32 4294901760, %v2828_v41 }
  0x4b   :  { %547 = vmatpush.msrb.mxu2 %v2022_v59  ;;  %v173_v34 = vperm.slane %v2114_v7, 0  ;;  %v174_v9 = vperm.slane %v2114_v7, 1  ;;  %646 = vmatpush.msrb.mxu3 %v645_v33 }
  0x4c   :  { %475 = vmatpush.msrb.mxu0 %v2825_v27  ;;  %506 = vmatpush.msrb.mxu1 %v1802_v44 }
  0x4d   :  { %549 = vmatpush.msrb.mxu2 %v2035_v18  ;;  %v213_v13 = vand.u32 4294901760, %v173_v34  ;;  %v2129_v11 = vand.u32 4294901760, %v174_v9  ;;  %652 = vmatpush.msrb.mxu3 %v651_v39 }
  0x4e   :  { %479 = vmatpush.msrb.mxu0 %v2826_v15  ;;  %508 = vmatpush.msrb.mxu1 %v1814_v50 }
  0x4f   :  { %551 = vmatpush.msrb.mxu2 %v2048_v36  ;;  %v214_v44 = vsub.f32 %v173_v34, %v213_v13  ;;  %v2134_v61 = vsub.f32 %v174_v9, %v2129_v11  ;;  %658 = vmatpush.msrb.mxu3 %v657_v49  ;;  %v146_v34 = vld [vmem:[#allocation7 + $0x130] sm:$0xff]  ;;  %v145_v49 = vld [vmem:[#allocation7 + $0x128] sm:$0xff] }
  0x50   :  { %510 = vmatpush.msrb.mxu1 %v1822_v53 }
  0x51   :  { %553 = vmatpush.msrb.mxu2 %v2061_v40  ;;  %v215_v55 = vand.u32 4294901760, %v214_v44  ;;  %v556_v50 = vand.u32 4294901760, %v2134_v61  ;;  %319 = vmatmul.f32.vlgmr.msra.gmra.mxu1 %v213_v13 }
  0x52   :  { %512 = vmatpush.msrb.mxu1 %v1838_v63  ;;  %373 = vmatmul.f32.vlgmr.msra.gmra.mxu2 %v214_v44  ;;  %v2830_v63 = vld [vmem:[#allocation12_spill] sm:$0xff] }
  0x53   :  { %760 = vmatpush.msra.mxu2 %v2827_v0  ;;  %v216_v53 = vsub.f32 %v214_v44, %v215_v55  ;;  %412 = vmatmul.f32.vlgmr.msra.gmra.mxu3 %v215_v55  ;;  %v557_v5 = vsub.f32 %v2134_v61, %v556_v50  ;;  %v2289_v55 = vand.u32 4294901760, %v146_v34 }
  0x54   :  { %514 = vmatpush.msrb.mxu1 %v1855_v21  ;;  %827 = vmatpush.msra.mxu3 %v2830_v63  ;;  %v2833_v21 = vand.u32 4294901760, %v2832_v43 }
  0x55   :  { %764 = vmatpush.msra.mxu2 %v2829_v58  ;;  %v217_v38 = vand.u32 4294901760, %v216_v53  ;;  %v558_v32 = vand.u32 4294901760, %v557_v5 }
  0x56   :  { %516 = vmatpush.msrb.mxu1 %v2831_v17  ;;  %829 = vmatpush.msra.mxu3 %v1862_v31 }
  0x57   :  { %768 = vmatpush.msra.mxu2 %v2833_v21  ;;  %218 = vmatmul.f32.vlgmr.msra.gmra.mxu0 %v217_v38 }
  0x58   :  { %719 = vmatpush.msra.mxu1 %v2830_v63  ;;  %666 = vmatpush.msra.mxu0 %v1876_v42  ;;  %v2837_v42 = vand.u32 4294901760, %v1971_v56 }
  0x59   :  { %831 = vmatpush.msra.mxu3 %v1885_v54  ;;  %772 = vmatpush.msra.mxu2 %v2834_v25  ;;  %v142_v25 = vld [vmem:[#allocation7 + $0x110] sm:$0xff] }
  0x5a   :  { %721 = vmatpush.msra.mxu1 %v1862_v31  ;;  %559 = vmatmul.f32.vlgmr.msrb.gmra.mxu2 %v558_v32  ;;  %v2836_v31 = vand.u32 4294901760, %v1956_v24 }
  0x5b   :  { %669 = vmatpush.msra.mxu0 %v2828_v41  ;;  %660 = vmatmul.f32.vlgmr.msrb.gmra.mxu3 %v2129_v11  ;;  %v2301_v41 = vand.u32 4294901760, %v145_v49 }
  0x5c   :  { %723 = vmatpush.msra.mxu1 %v1885_v54  ;;  %776 = vmatpush.msra.mxu2 %v2835_v1  ;;  %v2838_v54 = vand.u32 4294901760, %v1977_v35  ;;  %v175_v1 = vperm.slane %v2114_v7, 2 }
  0x5d   :  { %672 = vmatpush.msra.mxu0 %v2832_v43  ;;  %833 = vmatpush.msra.mxu3 %v1900_v12  ;;  %v2317_v43 = vsub.f32 %v146_v34, %v2289_v55 }
  0x5e   :  { %518 = vmatmul.f32.vlgmr.msrb.gmra.mxu1 %v213_v13  ;;  %780 = vmatpush.msra.mxu2 %v2836_v31 }
  0x5f   :  { %675 = vmatpush.msra.mxu0 %v1924_v48  ;;  %725 = vmatpush.msra.mxu1 %v1900_v12  ;;  %v153_v12 = vld [vmem:[#allocation7 + $0x168] sm:$0xff]  ;;  %v2842_v48 = vand.u32 4294901760, %v2032_v37 }
  0x60   :  { %481 = vmatmul.f32.vlgmr.msrb.gmra.mxu0 %v213_v13  ;;  %835 = vmatpush.msra.mxu3 %v1913_v26 }
  0x61   :  { %678 = vmatpush.msra.mxu0 %v1939_v62  ;;  %727 = vmatpush.msra.mxu1 %v1913_v26  ;;  %v2839_v26 = vand.u32 4294901760, %v1990_v45  ;;  %v155_v62 = vld [vmem:[#allocation7 + $0x178] sm:$0xff] }
  0x62   :  { %784 = vmatpush.msra.mxu2 %v2837_v42  ;;  %837 = vmatpush.msra.mxu3 %v1926_v51 }
  0x63   :  { %681 = vmatpush.msra.mxu0 %v1956_v24  ;;  %729 = vmatpush.msra.mxu1 %v1926_v51  ;;  %v2840_v24 = vand.u32 4294901760, %v2003_v30  ;;  %v154_v51 = vld [vmem:[#allocation7 + $0x170] sm:$0xff] }
  0x64   :  { %788 = vmatpush.msra.mxu2 %v2838_v54  ;;  %839 = vmatpush.msra.mxu3 %v1941_v28 }
  0x65   :  { %684 = vmatpush.msra.mxu0 %v1971_v56  ;;  %731 = vmatpush.msra.mxu1 %v1941_v28  ;;  %v2190_v56 = vand.u32 4294901760, %v155_v62  ;;  %v2841_v28 = vand.u32 4294901760, %v2020_v16 }
  0x66   :  { %792 = vmatpush.msra.mxu2 %v2839_v26  ;;  %841 = vmatpush.msra.mxu3 %v1948_v6  ;;  %v2330_v26 = vsub.f32 %v145_v49, %v2301_v41 }
  0x67   :  { %687 = vmatpush.msra.mxu0 %v1977_v35  ;;  %733 = vmatpush.msra.mxu1 %v1948_v6  ;;  %v2197_v6 = vand.u32 4294901760, %v154_v51  ;;  %v152_v35 = vld [vmem:[#allocation7 + $0x160] sm:$0xff] }
  0x68   :  { %796 = vmatpush.msra.mxu2 %v2840_v24  ;;  %843 = vmatpush.msra.mxu3 %v1963_v47 }
  0x69   :  { %690 = vmatpush.msra.mxu0 %v1990_v45  ;;  %735 = vmatpush.msra.mxu1 %v1963_v47  ;;  %v2204_v47 = vand.u32 4294901760, %v153_v12  ;;  %v2207_v45 = vsub.f32 %v155_v62, %v2190_v56 }
  0x6a   :  { %800 = vmatpush.msra.mxu2 %v2841_v28  ;;  %845 = vmatpush.msra.mxu3 %v1979_v60  ;;  %v2782_v28 = vand.u32 4294901760, %v2317_v43 }
  0x6b   :  { %693 = vmatpush.msra.mxu0 %v2003_v30  ;;  %737 = vmatpush.msra.mxu1 %v1979_v60  ;;  %v151_v30 = vld [vmem:[#allocation7 + $0x158] sm:$0xff]  ;;  %v2214_v60 = vand.u32 4294901760, %v152_v35 }
  0x6c   :  { %804 = vmatpush.msra.mxu2 %v2842_v48  ;;  %847 = vmatpush.msra.mxu3 %v1997_v14  ;;  %v2222_v10 = vand.u32 4294901760, %v151_v30  ;;  %v141_v48 = vld [vmem:[#allocation7 + $0x108] sm:$0xff]  ;;  %v961_v34 = vsub.f32 %v2317_v43, %v2782_v28 }
  0x6d   :  { %696 = vmatpush.msra.mxu0 %v2020_v16  ;;  %739 = vmatpush.msra.mxu1 %v1997_v14  ;;  %v2217_v16 = vsub.f32 %v154_v51, %v2197_v6  ;;  %v906_v14 = vand.u32 4294901760, %v2207_v45  ;;  %v2338_v51 = vand.u32 4294901760, %v142_v25 }
  0x6e   :  { %808 = vmatpush.msra.mxu2 %v637_v8  ;;  %849 = vmatpush.msra.mxu3 %v2005_v2  ;;  %v2228_v8 = vsub.f32 %v153_v12, %v2204_v47 }
  0x6f   :  { %699 = vmatpush.msra.mxu0 %v2032_v37  ;;  %741 = vmatpush.msra.mxu1 %v2005_v2  ;;  %v2233_v2 = vand.u32 4294901760, %v150_v29  ;;  %v149_v37 = vld [vmem:[#allocation7 + $0x148] sm:$0xff]  ;;  %v2366_v49 = vsub.f32 %v142_v25, %v2338_v51 }
  0x70   :  { %812 = vmatpush.msra.mxu2 %v643_v20  ;;  %851 = vmatpush.msra.mxu3 %v2022_v59  ;;  %v2239_v20 = vsub.f32 %v152_v35, %v2214_v60  ;;  %v2252_v46 = vand.u32 4294901760, %v149_v37  ;;  %v2791_v33 = vand.u32 4294901760, %v2228_v8  ;;  %v2346_v35 = vand.u32 4294901760, %v175_v1 }
  0x71   :  { %702 = vmatpush.msra.mxu0 %v2046_v57  ;;  %743 = vmatpush.msra.mxu1 %v2022_v59  ;;  %v2795_v57 = vand.u32 4294901760, %v2217_v16  ;;  %v2245_v59 = vsub.f32 %v151_v30, %v2222_v10 }
  0x72   :  { %816 = vmatpush.msra.mxu2 %v649_v23  ;;  %853 = vmatpush.msra.mxu3 %v2035_v18  ;;  %v148_v23 = vld [vmem:[#allocation7 + $0x140] sm:$0xff]  ;;  %v2789_v27 = vand.u32 4294901760, %v2239_v20  ;;  %v919_v39 = vsub.f32 %v2228_v8, %v2791_v33  ;;  %v2279_v15 = vsub.f32 %v149_v37, %v2252_v46  ;;  %v2780_v37 = vand.u32 4294901760, %v2330_v26 }
  0x73   :  { %705 = vmatpush.msra.mxu0 %v2059_v19  ;;  %745 = vmatpush.msra.mxu1 %v2035_v18  ;;  %v907_v19 = vsub.f32 %v2207_v45, %v906_v14  ;;  %v2258_v18 = vsub.f32 %v150_v29, %v2233_v2  ;;  %v2265_v4 = vand.u32 4294901760, %v148_v23 }
  0x74   :  { %820 = vmatpush.msra.mxu2 %v655_v3  ;;  %855 = vmatpush.msra.mxu3 %v2048_v36  ;;  %v147_v3 = vld [vmem:[#allocation7 + $0x138] sm:$0xff]  ;;  %v925_v44 = vsub.f32 %v2239_v20, %v2789_v27  ;;  %v920_v5 = vand.u32 4294901760, %v919_v39  ;;  %v2786_v58 = vand.u32 4294901760, %v2279_v15 }
  0x75   :  { %708 = vmatpush.msra.mxu0 %v2072_v22  ;;  %822 = vmatmul.f32.vlgmr.msra.gmra.mxu2 %v2129_v11  ;;  %v913_v22 = vsub.f32 %v2217_v16, %v2795_v57  ;;  %v2276_v9 = vand.u32 4294901760, %v147_v3  ;;  %v2787_v13 = vand.u32 4294901760, %v2258_v18  ;;  %v2292_v0 = vsub.f32 %v148_v23, %v2265_v4  ;;  %v162_v57 = vld [vmem:[#allocation7 + $0x1b0] sm:$0xff] }
  0x76   :  { %747 = vmatpush.msra.mxu1 %v2048_v36  ;;  %1007 = vmatpush.msrb.mxu2 %v2207_v45  ;;  %v2788_v36 = vand.u32 4294901760, %v2245_v59  ;;  %v926_v38 = vand.u32 4294901760, %v925_v44  ;;  %v943_v31 = vsub.f32 %v2279_v15, %v2786_v58  ;;  %v2845_v45 = vand.u32 4294901760, %v2217_v16 }
  0x77   :  { %711 = vmatpush.msra.mxu0 %v2085_v52  ;;  %857 = vmatpush.msra.mxu3 %v2061_v40  ;;  %v908_v52 = vand.u32 4294901760, %v907_v19  ;;  %v2305_v63 = vsub.f32 %v147_v3, %v2276_v9  ;;  %v2785_v32 = vand.u32 4294901760, %v2292_v0  ;;  %v2358_v19 = vand.u32 4294901760, %v141_v48  ;;  %v171_v3 = vld [vmem:[#allocation7 + $0x1f8] sm:$0xff] }
  0x78   :  { %714 = vmatmul.f32.vlgmr.msra.gmra.mxu0 %v2134_v61  ;;  %859 = vmatmul.f32.vlgmr.msra.gmra.mxu3 %v2129_v11  ;;  %v914_v11 = vand.u32 4294901760, %v913_v22  ;;  %v931_v53 = vsub.f32 %v2245_v59, %v2788_v36  ;;  %v937_v61 = vsub.f32 %v2258_v18, %v2787_v13  ;;  %v944_v30 = vand.u32 4294901760, %v943_v31  ;;  %v169_v31 = vld [vmem:[#allocation7 + $0x1e8] sm:$0xff] }
  0x79   :  { %864 = vmatpush.msrb.mxu0 %v2190_v56  ;;  %1010 = vmatpush.msrb.mxu2 %v2217_v16  ;;  %v2783_v54 = vand.u32 4294901760, %v2305_v63  ;;  %v949_v24 = vsub.f32 %v2292_v0, %v2785_v32  ;;  %2843 = vst [vmem:[#allocation14_spill] sm:$0xff] %v2358_v19  ;;  %v165_v13 = vld [vmem:[#allocation7 + $0x1c8] sm:$0xff]  ;;  %v2500_v16 = vand.u32 4294901760, %v162_v57 }
  0x7a   :  { %1060 = vmatpush.msrb.mxu3 %v2190_v56  ;;  %749 = vmatpush.msra.mxu1 %v2061_v40  ;;  %v144_v40 = vld [vmem:[#allocation7 + $0x120] sm:$0xff]  ;;  %v932_v21 = vand.u32 4294901760, %v931_v53  ;;  %v938_v62 = vand.u32 4294901760, %v937_v61  ;;  %v967_v53 = vsub.f32 %v2330_v26, %v2780_v37  ;;  %v170_v61 = vld [vmem:[#allocation7 + $0x1f0] sm:$0xff]  ;;  %v2410_v37 = vand.u32 4294901760, %v169_v31 }
  0x7b   :  { %866 = vmatpush.msrb.mxu0 %v2197_v6  ;;  %753 = vmatmul.f32.vlgmr.msra.gmra.mxu1 %v556_v50  ;;  %v143_v50 = vld [vmem:[#allocation7 + $0x118] sm:$0xff]  ;;  %v2313_v17 = vand.u32 4294901760, %v144_v40  ;;  %v955_v29 = vsub.f32 %v2305_v63, %v2783_v54  ;;  %v950_v22 = vand.u32 4294901760, %v949_v24  ;;  %v2395_v24 = vand.u32 4294901760, %v170_v61  ;;  %v166_v54 = vld [vmem:[#allocation7 + $0x1d0] sm:$0xff] }
  0x7c   :  { %1013 = vmatpush.msrb.mxu2 %v2228_v8  ;;  %909 = vmatpush.msrb.mxu1 %v908_v52  ;;  %v2326_v42 = vand.u32 4294901760, %v143_v50  ;;  %v140_v52 = vld [vmem:[#allocation7 + $0x100] sm:$0xff]  ;;  %v2437_v58 = vsub.f32 %v169_v31, %v2410_v37 }
  0x7d   :  { %868 = vmatpush.msrb.mxu0 %v2204_v47  ;;  %1062 = vmatpush.msrb.mxu3 %v2197_v6  ;;  %v2342_v12 = vsub.f32 %v144_v40, %v2313_v17  ;;  %v956_v44 = vand.u32 4294901760, %v955_v29  ;;  %2844 = vst [vmem:[#allocation12_spill] sm:$0xff] %v2395_v24 }
  0x7e   :  { %1016 = vmatpush.msrb.mxu2 %v2239_v20  ;;  %915 = vmatpush.msrb.mxu1 %v914_v11  ;;  %v2354_v23 = vsub.f32 %v143_v50, %v2326_v42  ;;  %v2371_v11 = vsub.f32 %v175_v1, %v2346_v35  ;;  %v2382_v50 = vand.u32 4294901760, %v140_v52  ;;  %v2784_v1 = vand.u32 4294901760, %v2366_v49 }
  0x7f   :  { %870 = vmatpush.msrb.mxu0 %v2214_v60  ;;  %1064 = vmatpush.msrb.mxu3 %v2204_v47  ;;  %v2779_v39 = vand.u32 4294901760, %v2342_v12  ;;  %v2798_v33 = vand.u32 4294901760, %v2437_v58 }
  0x80   :  { %1019 = vmatpush.msrb.mxu2 %v2245_v59  ;;  %921 = vmatpush.msrb.mxu1 %v920_v5  ;;  %v2781_v40 = vand.u32 4294901760, %v2354_v23  ;;  %v2378_v5 = vand.u32 4294901760, %v171_v3 }
  0x81   :  { %872 = vmatpush.msrb.mxu0 %v2222_v10  ;;  %1066 = vmatpush.msrb.mxu3 %v2214_v60  ;;  %v973_v25 = vsub.f32 %v2342_v12, %v2779_v39 }
  0x82   :  { %1022 = vmatpush.msrb.mxu2 %v2258_v18  ;;  %927 = vmatpush.msrb.mxu1 %v926_v38  ;;  %v2385_v38 = vsub.f32 %v141_v48, %v2358_v19  ;;  %v968_v48 = vand.u32 4294901760, %v967_v53  ;;  %v2402_v29 = vsub.f32 %v171_v3, %v2378_v5  ;;  %v985_v3 = vsub.f32 %v2366_v49, %v2784_v1 }
  0x83   :  { %874 = vmatpush.msrb.mxu0 %v2233_v2  ;;  %1068 = vmatpush.msrb.mxu3 %v2222_v10  ;;  %v974_v53 = vand.u32 4294901760, %v973_v25 }
  0x84   :  { %1025 = vmatpush.msrb.mxu2 %v2279_v15  ;;  %933 = vmatpush.msrb.mxu1 %v932_v21  ;;  %v962_v21 = vand.u32 4294901760, %v961_v34  ;;  %v2407_v34 = vsub.f32 %v140_v52, %v2382_v50  ;;  %v2790_v39 = vand.u32 4294901760, %v2385_v38  ;;  %v2792_v25 = vand.u32 4294901760, %v2402_v29 }
  0x85   :  { %876 = vmatpush.msrb.mxu0 %v2252_v46  ;;  %1070 = vmatpush.msrb.mxu3 %v2233_v2 }
  0x86   :  { %1028 = vmatpush.msrb.mxu2 %v2292_v0  ;;  %939 = vmatpush.msrb.mxu1 %v938_v62  ;;  %v2794_v62 = vand.u32 4294901760, %v2371_v11  ;;  %v2793_v32 = vand.u32 4294901760, %v2407_v34  ;;  %v1248_v31 = vsub.f32 %v2402_v29, %v2792_v25  ;;  %v163_v25 = vld [vmem:[#allocation7 + $0x1b8] sm:$0xff] }
  0x87   :  { %878 = vmatpush.msrb.mxu0 %v2265_v4  ;;  %1072 = vmatpush.msrb.mxu3 %v2252_v46 }
  0x88   :  { %1031 = vmatpush.msrb.mxu2 %v2305_v63  ;;  %945 = vmatpush.msrb.mxu1 %v944_v30  ;;  %v979_v30 = vsub.f32 %v2354_v23, %v2781_v40  ;;  %v898_v52 = vsub.f32 %v2371_v11, %v2794_v62  ;;  %v2422_v40 = vsub.f32 %v170_v61, %v2395_v24 }
  0x89   :  { %880 = vmatpush.msrb.mxu0 %v2276_v9  ;;  %1074 = vmatpush.msrb.mxu3 %v2265_v4  ;;  %v991_v61 = vsub.f32 %v2385_v38, %v2790_v39 }
  0x8a   :  { %1034 = vmatpush.msrb.mxu2 %v2317_v43  ;;  %951 = vmatpush.msrb.mxu1 %v950_v22  ;;  %v168_v22 = vld [vmem:[#allocation7 + $0x1e0] sm:$0xff]  ;;  %v899_v36 = vand.u32 4294901760, %v898_v52  ;;  %v2796_v27 = vand.u32 4294901760, %v2422_v40 }
  0x8b   :  { %882 = vmatpush.msrb.mxu0 %v2289_v55  ;;  %1076 = vmatpush.msrb.mxu3 %v2276_v9  ;;  %v2424_v28 = vand.u32 4294901760, %v168_v22  ;;  %v992_v52 = vand.u32 4294901760, %v991_v61 }
  0x8c   :  { %1037 = vmatpush.msrb.mxu2 %v2330_v26  ;;  %957 = vmatpush.msrb.mxu1 %v956_v44  ;;  %v167_v44 = vld [vmem:[#allocation7 + $0x1d8] sm:$0xff]  ;;  %v1254_v61 = vsub.f32 %v2422_v40, %v2796_v27  ;;  %v1260_v27 = vsub.f32 %v2437_v58, %v2798_v33 }
  0x8d   :  { %884 = vmatpush.msrb.mxu0 %v2301_v41  ;;  %1078 = vmatpush.msrb.mxu3 %v2289_v55  ;;  %v2428_v1 = vand.u32 4294901760, %v167_v44  ;;  %v2446_v39 = vsub.f32 %v168_v22, %v2424_v28  ;;  %v997_v22 = vsub.f32 %v2407_v34, %v2793_v32 }
  0x8e   :  { %1040 = vmatpush.msrb.mxu2 %v2342_v12  ;;  %963 = vmatpush.msrb.mxu1 %v962_v21  ;;  %v980_v21 = vand.u32 4294901760, %v979_v30  ;;  %v2440_v30 = vand.u32 4294901760, %v166_v54 }
  0x8f   :  { %886 = vmatpush.msrb.mxu0 %v2313_v17  ;;  %1080 = vmatpush.msrb.mxu3 %v2301_v41  ;;  %v2847_v33 = vand.u32 4294901760, %v2446_v39 }
  0x90   :  { %1043 = vmatpush.msrb.mxu2 %v2354_v23  ;;  %969 = vmatpush.msrb.mxu1 %v968_v48  ;;  %v986_v48 = vand.u32 4294901760, %v985_v3  ;;  %v164_v3 = vld [vmem:[#allocation7 + $0x1c0] sm:$0xff] }
  0x91   :  { %888 = vmatpush.msrb.mxu0 %v2326_v42  ;;  %1082 = vmatpush.msrb.mxu3 %v2313_v17  ;;  %v2472_v62 = vand.u32 4294901760, %v164_v3 }
  0x92   :  { %1046 = vmatpush.msrb.mxu2 %v2366_v49  ;;  %975 = vmatpush.msrb.mxu1 %v974_v53  ;;  %v2453_v53 = vsub.f32 %v167_v44, %v2428_v1  ;;  %v2465_v44 = vsub.f32 %v166_v54, %v2440_v30 }
  0x93   :  { %890 = vmatpush.msrb.mxu0 %v2338_v51  ;;  %1084 = vmatpush.msrb.mxu3 %v2326_v42  ;;  %v2498_v54 = vsub.f32 %v164_v3, %v2472_v62 }
  0x94   :  { %1049 = vmatpush.msrb.mxu2 %v2385_v38  ;;  %981 = vmatpush.msrb.mxu1 %v980_v21  ;;  %v2461_v21 = vand.u32 4294901760, %v165_v13 }
  0x95   :  { %892 = vmatpush.msrb.mxu0 %v2358_v19  ;;  %1086 = vmatpush.msrb.mxu3 %v2338_v51 }
  0x96   :  { %1052 = vmatpush.msrb.mxu2 %v2407_v34  ;;  %987 = vmatpush.msrb.mxu1 %v986_v48  ;;  %v1249_v48 = vand.u32 4294901760, %v1248_v31  ;;  %v2483_v32 = vsub.f32 %v165_v13, %v2461_v21  ;;  %v161_v31 = vld [vmem:[#allocation7 + $0x1a8] sm:$0xff]  ;;  %v1266_v13 = vsub.f32 %v2446_v39, %v2847_v33 }
  0x97   :  { %894 = vmatpush.msrb.mxu0 %v2382_v50  ;;  %1088 = vmatpush.msrb.mxu3 %v2358_v19  ;;  %v2485_v19 = vand.u32 4294901760, %v163_v25 }
  0x98   :  { %900 = vmatmul.f32.vlgmr.msrb.gmra.mxu0 %v899_v36  ;;  %1055 = vmatmul.f32.vlgmr.msrb.gmra.mxu2 %v2371_v11  ;;  %v998_v36 = vand.u32 4294901760, %v997_v22  ;;  %v1255_v22 = vand.u32 4294901760, %v1254_v61  ;;  %v1261_v61 = vand.u32 4294901760, %v1260_v27  ;;  %v1267_v27 = vand.u32 4294901760, %v1266_v13 }
  0x99   :  { %1101 = vmatpush.msra.mxu0 %v906_v14  ;;  %1205 = vmatpush.msra.mxu2 %v2378_v5  ;;  %v2849_v14 = vand.u32 4294901760, %v2453_v53  ;;  %v2510_v3 = vsub.f32 %v163_v25, %v2485_v19  ;;  %v2523_v25 = vsub.f32 %v162_v57, %v2500_v16  ;;  %v176_v13 = vperm.slane %v2114_v7, 3 }
  0x9a   :  { %993 = vmatpush.msrb.mxu1 %v992_v52  ;;  %1090 = vmatpush.msrb.mxu3 %v2382_v50  ;;  %v2846_v52 = vand.u32 4294901760, %v2371_v11  ;;  %v2858_v7 = vand.u32 4294901760, %v2292_v0  ;;  %v2859_v0 = vand.u32 4294901760, %v2305_v63  ;;  %v2860_v63 = vand.u32 4294901760, %v2317_v43 }
  0x9b   :  { %1105 = vmatpush.msra.mxu0 %v2845_v45  ;;  %1207 = vmatpush.msra.mxu2 %v2395_v24  ;;  %v2848_v45 = vand.u32 4294901760, %v2228_v8  ;;  %v1272_v11 = vsub.f32 %v2453_v53, %v2849_v14  ;;  %v2512_v24 = vand.u32 4294901760, %v161_v31  ;;  %v2850_v8 = vand.u32 4294901760, %v2239_v20 }
  0x9c   :  { %1094 = vmatmul.f32.vlgmr.msrb.gmra.mxu3 %v2846_v52  ;;  %v160_v52 = vld [vmem:[#allocation7 + $0x1a0] sm:$0xff]  ;;  %999 = vmatpush.msrb.mxu1 %v998_v36  ;;  %v159_v36 = vld [vmem:[#allocation7 + $0x198] sm:$0xff]  ;;  %v2852_v20 = vand.u32 4294901760, %v2245_v59  ;;  %v2854_v59 = vand.u32 4294901760, %v2258_v18  ;;  %v2856_v18 = vand.u32 4294901760, %v2279_v15 }
  0x9d   :  { %1109 = vmatpush.msra.mxu0 %v2848_v45  ;;  %1250 = vmatpush.msra.mxu3 %v1249_v48  ;;  %v2851_v48 = vand.u32 4294901760, %v2465_v44  ;;  %v2525_v33 = vand.u32 4294901760, %v160_v52  ;;  %v2536_v57 = vsub.f32 %v161_v31, %v2512_v24  ;;  %v158_v45 = vld [vmem:[#allocation7 + $0x190] sm:$0xff] }
  0x9e   :  { %1209 = vmatpush.msra.mxu2 %v2410_v37  ;;  %1001 = vmatmul.f32.vlgmr.msrb.gmra.mxu1 %v2346_v35 }
  0x9f   :  { %1113 = vmatpush.msra.mxu0 %v2850_v8  ;;  %v1278_v14 = vsub.f32 %v2465_v44, %v2851_v48  ;;  %1168 = vmatpush.msra.mxu1 %v2190_v56  ;;  %v1273_v8 = vand.u32 4294901760, %v1272_v11  ;;  %v2853_v56 = vand.u32 4294901760, %v2483_v32  ;;  %v2538_v48 = vand.u32 4294901760, %v159_v36 }
  0xa0   :  { %1256 = vmatpush.msra.mxu3 %v1255_v22  ;;  %1211 = vmatpush.msra.mxu2 %v2424_v28  ;;  %v2549_v31 = vsub.f32 %v160_v52, %v2525_v33  ;;  %v1307_v52 = vand.u32 4294901760, %v2536_v57 }
  0xa1   :  { %1117 = vmatpush.msra.mxu0 %v2852_v20  ;;  %1170 = vmatpush.msra.mxu1 %v2197_v6  ;;  %v1284_v22 = vsub.f32 %v2483_v32, %v2853_v56  ;;  %v1279_v11 = vand.u32 4294901760, %v1278_v14  ;;  %v2855_v6 = vand.u32 4294901760, %v2498_v54  ;;  %v1301_v20 = vand.u32 4294901760, %v2523_v25  ;;  %v157_v56 = vld [vmem:[#allocation7 + $0x188] sm:$0xff] }
  0xa2   :  { %1262 = vmatpush.msra.mxu3 %v1261_v61  ;;  %1213 = vmatpush.msra.mxu2 %v2428_v1  ;;  %v2555_v14 = vand.u32 4294901760, %v158_v45  ;;  %v2568_v15 = vand.u32 4294901760, %v157_v56 }
  0xa3   :  { %1121 = vmatpush.msra.mxu0 %v2854_v59  ;;  %1172 = vmatpush.msra.mxu1 %v2204_v47  ;;  %v1290_v61 = vsub.f32 %v2498_v54, %v2855_v6  ;;  %v1285_v47 = vand.u32 4294901760, %v1284_v22  ;;  %v2563_v6 = vsub.f32 %v159_v36, %v2538_v48  ;;  %v1313_v22 = vand.u32 4294901760, %v2549_v31 }
  0xa4   :  { %1268 = vmatpush.msra.mxu3 %v1267_v27  ;;  %1215 = vmatpush.msra.mxu2 %v2440_v30  ;;  %v2857_v27 = vand.u32 4294901760, %v2510_v3  ;;  %v2575_v36 = vand.u32 4294901760, %v176_v13 }
  0xa5   :  { %1125 = vmatpush.msra.mxu0 %v2856_v18  ;;  %1174 = vmatpush.msra.mxu1 %v2214_v60  ;;  %v156_v18 = vld [vmem:[#allocation7 + $0x180] sm:$0xff]  ;;  %v1291_v60 = vand.u32 4294901760, %v1290_v61  ;;  %v1319_v61 = vand.u32 4294901760, %v2563_v6 }
  0xa6   :  { %1274 = vmatpush.msra.mxu3 %v1273_v8  ;;  %v1296_v59 = vsub.f32 %v2510_v3, %v2857_v27  ;;  %1217 = vmatpush.msra.mxu2 %v2461_v21  ;;  %v1302_v8 = vsub.f32 %v2523_v25, %v1301_v20  ;;  %v2581_v27 = vsub.f32 %v158_v45, %v2555_v14 }
  0xa7   :  { %1129 = vmatpush.msra.mxu0 %v2858_v7  ;;  %1176 = vmatpush.msra.mxu1 %v2222_v10  ;;  %v2588_v7 = vand.u32 4294901760, %v156_v18  ;;  %v2594_v45 = vsub.f32 %v157_v56, %v2568_v15  ;;  %v1320_v56 = vsub.f32 %v2563_v6, %v1319_v61 }
  0xa8   :  { %1280 = vmatpush.msra.mxu3 %v1279_v11  ;;  %1219 = vmatpush.msra.mxu2 %v2472_v62  ;;  %v1297_v10 = vand.u32 4294901760, %v1296_v59  ;;  %v1308_v11 = vsub.f32 %v2536_v57, %v1307_v52  ;;  %v2601_v59 = vsub.f32 %v176_v13, %v2575_v36  ;;  %v1325_v43 = vand.u32 4294901760, %v2581_v27 }
  0xa9   :  { %1133 = vmatpush.msra.mxu0 %v2859_v0  ;;  %1178 = vmatpush.msra.mxu1 %v2233_v2  ;;  %v1303_v2 = vand.u32 4294901760, %v1302_v8  ;;  %v2861_v0 = vand.u32 4294901760, %v2330_v26  ;;  %v2862_v13 = vand.u32 4294901760, %v2342_v12  ;;  %v1331_v26 = vand.u32 4294901760, %v2594_v45 }
  0xaa   :  { %1286 = vmatpush.msra.mxu3 %v1285_v47  ;;  %1221 = vmatpush.msra.mxu2 %v2485_v19  ;;  %v1314_v47 = vsub.f32 %v2549_v31, %v1313_v22  ;;  %v1238_v8 = vand.u32 4294901760, %v2601_v59  ;;  %v1326_v12 = vsub.f32 %v2581_v27, %v1325_v43 }
  0xab   :  { %1137 = vmatpush.msra.mxu0 %v2860_v63  ;;  %1180 = vmatpush.msra.mxu1 %v2252_v46  ;;  %v1309_v46 = vand.u32 4294901760, %v1308_v11  ;;  %v2865_v63 = vand.u32 4294901760, %v2385_v38 }
  0xac   :  { %1292 = vmatpush.msra.mxu3 %v1291_v60  ;;  %1223 = vmatpush.msra.mxu2 %v2500_v16  ;;  %v2612_v60 = vsub.f32 %v156_v18, %v2588_v7  ;;  %v1321_v18 = vand.u32 4294901760, %v1320_v56 }
  0xad   :  { %1141 = vmatpush.msra.mxu0 %v2861_v0  ;;  %1182 = vmatpush.msra.mxu1 %v2265_v4  ;;  %v1315_v4 = vand.u32 4294901760, %v1314_v47  ;;  %v2868_v0 = vand.u32 4294901760, %v2402_v29 }
  0xae   :  { %1298 = vmatpush.msra.mxu3 %v1297_v10  ;;  %1225 = vmatpush.msra.mxu2 %v2512_v24  ;;  %v2863_v10 = vand.u32 4294901760, %v2354_v23  ;;  %v1337_v11 = vand.u32 4294901760, %v2612_v60  ;;  %v1332_v23 = vsub.f32 %v2594_v45, %v1331_v26 }
  0xaf   :  { %1145 = vmatpush.msra.mxu0 %v2862_v13  ;;  %1184 = vmatpush.msra.mxu1 %v2276_v9  ;;  %v2864_v9 = vand.u32 4294901760, %v2366_v49  ;;  %v1327_v49 = vand.u32 4294901760, %v1326_v12 }
  0xb0   :  { %1304 = vmatpush.msra.mxu3 %v1303_v2  ;;  %1227 = vmatpush.msra.mxu2 %v2525_v33  ;;  %v1338_v2 = vsub.f32 %v2612_v60, %v1337_v11  ;;  %v1333_v47 = vand.u32 4294901760, %v1332_v23 }
  0xb1   :  { %1149 = vmatpush.msra.mxu0 %v2863_v10  ;;  %1186 = vmatpush.msra.mxu1 %v2289_v55  ;;  %v1239_v55 = vsub.f32 %v2601_v59, %v1238_v8 }
  0xb2   :  { %1310 = vmatpush.msra.mxu3 %v1309_v46  ;;  %1229 = vmatpush.msra.mxu2 %v2538_v48 }
  0xb3   :  { %1153 = vmatpush.msra.mxu0 %v2864_v9  ;;  %1188 = vmatpush.msra.mxu1 %v2301_v41  ;;  %v2866_v41 = vand.u32 4294901760, %v2407_v34  ;;  %v1240_v38 = vand.u32 4294901760, %v1239_v55  ;;  %v2867_v34 = vld [vmem:[#allocation14_spill] sm:$0xff] }
  0xb4   :  { %1316 = vmatpush.msra.mxu3 %v1315_v4  ;;  %1231 = vmatpush.msra.mxu2 %v2555_v14 }
  0xb5   :  { %1157 = vmatpush.msra.mxu0 %v2865_v63  ;;  %1190 = vmatpush.msra.mxu1 %v2313_v17  ;;  %v1339_v17 = vand.u32 4294901760, %v1338_v2  ;;  %v90_v63 = vld [vmem:[%s2749_s2] sm:$0x1] }
  0xb6   :  { %1322 = vmatpush.msra.mxu3 %v1321_v18  ;;  %1233 = vmatpush.msra.mxu2 %v2568_v15 }
  0xb7   :  { %1161 = vmatpush.msra.mxu0 %v2866_v41  ;;  %1192 = vmatpush.msra.mxu1 %v2326_v42  ;;  %v2869_v42 = vand.u32 4294901760, %v2422_v40 }
  0xb8   :  { %1163 = vmatmul.f32.vlgmr.msra.gmra.mxu0 %v2346_v35  ;;  %1328 = vmatpush.msra.mxu3 %v1327_v49 }
  0xb9   :  { %1348 = vmatpush.msrb.mxu0 %v2402_v29  ;;  %1194 = vmatpush.msra.mxu1 %v2338_v51  ;;  %v2870_v51 = vand.u32 4294901760, %v2437_v58  ;;  %v2871_v29 = vld [vmem:[#allocation12_spill] sm:$0xff] }
  0xba   :  { %1235 = vmatpush.msra.mxu2 %v2588_v7  ;;  %1334 = vmatpush.msra.mxu3 %v1333_v47 }
  0xbb   :  { %1351 = vmatpush.msrb.mxu0 %v2422_v40  ;;  %1241 = vmatmul.f32.vlgmr.msra.gmra.mxu2 %v1240_v38  ;;  %v2872_v40 = vand.u32 4294901760, %v2446_v39 }
  0xbc   :  { %1196 = vmatpush.msra.mxu1 %v2867_v34  ;;  %1442 = vmatpush.msrb.mxu2 %v2868_v0 }
  0xbd   :  { %1354 = vmatpush.msrb.mxu0 %v2437_v58  ;;  %1340 = vmatpush.msra.mxu3 %v1339_v17  ;;  %v2874_v58 = vand.u32 4294901760, %v2465_v44 }
  0xbe   :  { %1198 = vmatpush.msra.mxu1 %v2382_v50  ;;  %1342 = vmatmul.f32.vlgmr.msra.gmra.mxu3 %v2575_v36 }
  0xbf   :  { %1357 = vmatpush.msrb.mxu0 %v2446_v39  ;;  %1446 = vmatpush.msrb.mxu2 %v2869_v42  ;;  %v2877_v39 = vand.u32 4294901760, %v2510_v3 }
  0xc0   :  { %1509 = vmatpush.msrb.mxu3 %v2378_v5  ;;  %1200 = vmatmul.f32.vlgmr.msra.gmra.mxu1 %v2346_v35  ;;  %v2873_v35 = vand.u32 4294901760, %v2453_v53 }
  0xc1   :  { %1360 = vmatpush.msrb.mxu0 %v2453_v53  ;;  %1401 = vmatpush.msrb.mxu1 %v2378_v5 }
  0xc2   :  { %1450 = vmatpush.msrb.mxu2 %v2870_v51  ;;  %1511 = vmatpush.msrb.mxu3 %v2871_v29 }
  0xc3   :  { %1363 = vmatpush.msrb.mxu0 %v2465_v44  ;;  %1403 = vmatpush.msrb.mxu1 %v2871_v29 }
  0xc4   :  { %1454 = vmatpush.msrb.mxu2 %v2872_v40  ;;  %1513 = vmatpush.msrb.mxu3 %v2410_v37 }
  0xc5   :  { %1366 = vmatpush.msrb.mxu0 %v2483_v32  ;;  %1405 = vmatpush.msrb.mxu1 %v2410_v37  ;;  %v2875_v37 = vand.u32 4294901760, %v2483_v32 }
  0xc6   :  { %1458 = vmatpush.msrb.mxu2 %v2873_v35  ;;  %1515 = vmatpush.msrb.mxu3 %v2424_v28 }
  0xc7   :  { %1369 = vmatpush.msrb.mxu0 %v2498_v54  ;;  %1407 = vmatpush.msrb.mxu1 %v2424_v28  ;;  %v2876_v28 = vand.u32 4294901760, %v2498_v54 }
  0xc8   :  { %1462 = vmatpush.msrb.mxu2 %v2874_v58  ;;  %1517 = vmatpush.msrb.mxu3 %v2428_v1 }
  0xc9   :  { %1372 = vmatpush.msrb.mxu0 %v2510_v3  ;;  %1409 = vmatpush.msrb.mxu1 %v2428_v1 }
  0xca   :  { %1466 = vmatpush.msrb.mxu2 %v2875_v37  ;;  %1519 = vmatpush.msrb.mxu3 %v2440_v30 }
  0xcb   :  { %1375 = vmatpush.msrb.mxu0 %v2523_v25  ;;  %1411 = vmatpush.msrb.mxu1 %v2440_v30 }
  0xcc   :  { %1470 = vmatpush.msrb.mxu2 %v2876_v28  ;;  %1521 = vmatpush.msrb.mxu3 %v2461_v21 }
  0xcd   :  { %1378 = vmatpush.msrb.mxu0 %v2536_v57  ;;  %1413 = vmatpush.msrb.mxu1 %v2461_v21 }
  0xce   :  { %1474 = vmatpush.msrb.mxu2 %v2877_v39  ;;  %1523 = vmatpush.msrb.mxu3 %v2472_v62  ;;  %v320_v32 = vpop.f32.mrf.mxu1 }
  0xcf   :  { %1381 = vmatpush.msrb.mxu0 %v2549_v31  ;;  %1415 = vmatpush.msrb.mxu1 %v2472_v62 }
  0xd0   :  { %1478 = vmatpush.msrb.mxu2 %v1301_v20  ;;  %1525 = vmatpush.msrb.mxu3 %v2485_v19 }
  0xd1   :  { %1384 = vmatpush.msrb.mxu0 %v2563_v6  ;;  %1417 = vmatpush.msrb.mxu1 %v2485_v19  ;;  %v1689_v6 = vmov 0.0  }
  0xd2   :  { %1482 = vmatpush.msrb.mxu2 %v1307_v52  ;;  %1527 = vmatpush.msrb.mxu3 %v2500_v16  ;;  %87 = vst [vmem:[#allocation8] sm:$0x1] %v1689_v6 }
  0xd3   :  { %1387 = vmatpush.msrb.mxu0 %v2581_v27  ;;  %1419 = vmatpush.msrb.mxu1 %v2500_v16 }
  0xd4   :  { %1486 = vmatpush.msrb.mxu2 %v1313_v22  ;;  %1529 = vmatpush.msrb.mxu3 %v2512_v24  ;;  %v219_v19 = vpop.f32.mrf.mxu0 }
  0xd5   :  { %1390 = vmatpush.msrb.mxu0 %v2594_v45  ;;  %1421 = vmatpush.msrb.mxu1 %v2512_v24  ;;  %v321_v5 = vadd.f32 %v320_v32, %v219_v19  ;;  %v374_v50 = vpop.f32.mrf.mxu2 }
  0xd6   :  { %1490 = vmatpush.msrb.mxu2 %v1319_v61  ;;  %1531 = vmatpush.msrb.mxu3 %v2525_v33  ;;  %v413_v62 = vpop.f32.mrf.mxu3 }
  0xd7   :  { %1393 = vmatpush.msrb.mxu0 %v2612_v60  ;;  %1423 = vmatpush.msrb.mxu1 %v2525_v33  ;;  %v375_v1 = vadd.f32 %v374_v50, %v321_v5 }
  0xd8   :  { %1494 = vmatpush.msrb.mxu2 %v1325_v43  ;;  %1533 = vmatpush.msrb.mxu3 %v2538_v48 }
  0xd9   :  { %1396 = vmatmul.f32.vlgmr.msrb.gmra.mxu0 %v2601_v59  ;;  %1425 = vmatpush.msrb.mxu1 %v2538_v48  ;;  %v414_v24 = vadd.f32 %v413_v62, %v375_v1  ;;  %v1546_v41 = vld [vmem:[#allocation8] sm:$0x1] }
  0xda   :  { %1498 = vmatpush.msrb.mxu2 %v1331_v26  ;;  %1535 = vmatpush.msrb.mxu3 %v2555_v14 }
  0xdb   :  { %1427 = vmatpush.msrb.mxu1 %v2555_v14  ;;  %v519_v21 = vpop.f32.mrf.mxu1 }
  0xdc   :  { %1502 = vmatpush.msrb.mxu2 %v1337_v11  ;;  %1537 = vmatpush.msrb.mxu3 %v2568_v15 }
  0xdd   :  { %1504 = vmatmul.f32.vlgmr.msrb.gmra.mxu2 %v2575_v36  ;;  %1429 = vmatpush.msrb.mxu1 %v2568_v15  ;;  %v482_v30 = vpop.f32.mrf.mxu0  ;;  %v560_v54 = vpop.f32.mrf.mxu2 }
  0xde   :  { %1539 = vmatpush.msrb.mxu3 %v2588_v7  ;;  %v483_v53 = vadd.f32 %v482_v30, %v414_v24  ;;  %v661_v33 = vpop.f32.mrf.mxu3 }
  0xdf   :  { %1541 = vmatmul.f32.vlgmr.msrb.gmra.mxu3 %v2575_v36  ;;  %1431 = vmatpush.msrb.mxu1 %v2588_v7 }
  0xe0   :  { %1435 = vmatmul.f32.vlgmr.msrb.gmra.mxu1 %v1238_v8  ;;  %v520_v44 = vadd.f32 %v519_v21, %v483_v53 }
  0xe2   :  { %v561_v16 = vadd.f32 %v560_v54, %v520_v44 }
  0xe4   :  { %v662_v25 = vadd.f32 %v661_v33, %v561_v16 }
  0xf5   :  { %v715_v3 = vpop.f32.mrf.mxu0 }
  0xf6   :  { %v716_v48 = vadd.f32 %v715_v3, %v662_v25 }
  0xf8   :  { %v754_v57 = vpop.f32.mrf.mxu1  ;;  %v823_v31 = vpop.f32.mrf.mxu2 }
  0xf9   :  { %v755_v20 = vadd.f32 %v754_v57, %v716_v48 }
  0xfb   :  { %v824_v14 = vadd.f32 %v823_v31, %v755_v20  ;;  %v860_v52 = vpop.f32.mrf.mxu3 }
  0xfd   :  { %v861_v22 = vadd.f32 %v860_v52, %v824_v14 }
 0x115   :  { %v901_v15 = vpop.f32.mrf.mxu0 }
 0x116   :  { %v902_v27 = vadd.f32 %v901_v15, %v861_v22 }
 0x11b   :  { %v1002_v36 = vpop.f32.mrf.mxu1  ;;  %v1056_v7 = vpop.f32.mrf.mxu2 }
 0x11c   :  { %v1003_v61 = vadd.f32 %v1002_v36, %v902_v27 }
 0x11e   :  { %v1057_v45 = vadd.f32 %v1056_v7, %v1003_v61 }
 0x11f   :  { %v1095_v59 = vpop.f32.mrf.mxu3 }
 0x120   :  { %v1096_v46 = vadd.f32 %v1095_v59, %v1057_v45 }
 0x135   :  { %v1164_v43 = vpop.f32.mrf.mxu0 }
 0x136   :  { %v1165_v60 = vadd.f32 %v1164_v43, %v1096_v46 }
 0x13d   :  { %v1201_v56 = vpop.f32.mrf.mxu1 }
 0x13e   :  { %v1202_v13 = vadd.f32 %v1201_v56, %v1165_v60  ;;  %v1242_v26 = vpop.f32.mrf.mxu2 }
 0x140   :  { %v1243_v4 = vadd.f32 %v1242_v26, %v1202_v13 }
 0x141   :  { %v1343_v8 = vpop.f32.mrf.mxu3 }
 0x142   :  { %v1344_v12 = vadd.f32 %v1343_v8, %v1243_v4 }
 0x156   :  { %v1397_v10 = vpop.f32.mrf.mxu0 }
 0x157   :  { %v1398_v18 = vadd.f32 %v1397_v10, %v1344_v12 }
 0x15d   :  { %v1436_v11 = vpop.f32.mrf.mxu1 }
 0x15e   :  { %v1437_v9 = vadd.f32 %v1436_v11, %v1398_v18 }
 0x160   :  { %v1505_v23 = vpop.f32.mrf.mxu2 }
 0x161   :  { %v1506_v55 = vadd.f32 %v1505_v23, %v1437_v9 }
 0x162   :  { %v1542_v49 = vpop.f32.mrf.mxu3 }
 0x163   :  { %v1543_v2 = vadd.f32 %v1542_v49, %v1506_v55 }
 0x165   :  { %v1545_v47 = vmul.f32 %v1543_v2, %v90_v63 }
 0x167   :  { %v1548_v38 = vadd.f32 %v1546_v41, %v1545_v47 }
 0x169   :  { %1549 = vst [vmem:[#allocation8] sm:$0x1] %v1548_v38 }
 0x16a   :  { %1560 = dma.vmem_to_hbm [thread:$0]  %s1556_s6, 16, %s1558_s9, [#allocation4]  }
 0x16b   :  { %1682 = dma.done.wait [#allocation4], 16  }
 0x16c   :  { %1683 = vsyncadd [#allocation4], 4294967280 }
 0x16d   :  { %1565 = vsyncpa [#allocation3], 1 }
 0x16e   :  { %1566 = vsyncpa [#allocation6], 1 }
 0x16f   :  { %1567 = vsyncpa [#allocation4], 1 }

</bundles_post_ra>
